<compile_context>
chip_gen: v7x
topology: tpu7x:2x2x1
jax: 0.10.0
libtpu: 0.0.40
codegen_flags: <defaults>
</compile_context>

<pallas_src>
import jax
import jax.numpy as jnp
from jax.experimental import pallas as pl
from jax.experimental.pallas import tpu as pltpu

BN_EPS = 1e-5


# ----------------------------------------------------------------------------
# in-kernel helpers
# ----------------------------------------------------------------------------
def _im2col_flat(x2d, Wp, P):
    """patches^T for a 3x3 conv from one flat-padded image.

    x2d : (Cin, Lp) bf16, lanes = flattened (H+2, W+2)(+2) padded image.
    Returns (9*Cin, P) with K ordered (kh, kw, cin): tap (kh, kw) is the
    contiguous lane slice starting at kh*Wp + kw, stacked on the sublane axis.
    """
    taps = [x2d[:, kh * Wp + kw: kh * Wp + kw + P]
            for kh in range(3) for kw in range(3)]
    return jnp.concatenate(taps, axis=0)


def _block_bn_stats(ys, mask, count):
    """Centred per-block BN stats over the valid lanes of a list of (C, P)
    f32 conv outputs.  mask is (1, P) f32 {0,1}.  Returns (mean, var), (C,1)."""
    inv = 1.0 / count
    s = sum(jnp.sum(y * mask, axis=1, keepdims=True) for y in ys)
    mean = s * inv
    m2 = sum(jnp.sum(((y - mean) ** 2) * mask, axis=1, keepdims=True) for y in ys)
    return mean, m2 * inv


# ----------------------------------------------------------------------------
# kernels
# ----------------------------------------------------------------------------
def _make_conv1_kernel(H, W, Wp, P):
    def kernel(xflat_ref, w_ref, mask_ref, y_ref, stat_ref):
        nb = xflat_ref.shape[0]
        w = w_ref[...]                                       # (Cout, 9*Cin) bf16
        mask = mask_ref[...]                                 # (1, P) f32
        ys = []
        for n in range(nb):
            patches = _im2col_flat(xflat_ref[n], Wp, P)      # (9*Cin, P) bf16
            y = jnp.dot(w, patches, preferred_element_type=jnp.float32)
            y_ref[n] = y.astype(y_ref.dtype)                 # raw conv1, bf16
            ys.append(y)
        mean, var = _block_bn_stats(ys, mask, nb * H * W)
        stat_ref[0] = jnp.concatenate([mean, var], axis=1)   # (C, 2)
    return kernel


def _make_conv2_kernel(H, W, Wp, P, Lp):
    head = Wp + 1   # flat-padded halo before the first interior pixel

    def kernel(y1_ref, scale_ref, shift_ref, w_ref, mask_ref,
               y2_ref, stat_ref, mid_ref):
        nb = y1_ref.shape[0]
        cin = mid_ref.shape[0]
        scale, shift = scale_ref[...], shift_ref[...]        # (C, 1) f32
        w = w_ref[...]
        mask = mask_ref[...]
        ys = []
        for n in range(nb):
            # bn1 affine + relu in f32; fold-over lanes zeroed so they double
            # as the W-padding zeros of the flat-padded stage-2 scratch.
            z = jnp.maximum(y1_ref[n].astype(jnp.float32) * scale + shift, 0.0)
            z = z * mask
            # Padded scratch: 2 contiguous head/tail halo zeros + 1 lane-dense
            # interior store — together they cover the whole (C, Lp) scratch.
            mid_ref[:, 0:head] = jnp.zeros((cin, head), mid_ref.dtype)
            mid_ref[:, head:head + P] = z.astype(mid_ref.dtype)
            mid_ref[:, head + P:Lp] = jnp.zeros((cin, Lp - head - P),
                                                mid_ref.dtype)
            patches = _im2col_flat(mid_ref[...], Wp, P)
            y = jnp.dot(w, patches, preferred_element_type=jnp.float32)
            y2_ref[n] = y.astype(y2_ref.dtype)               # raw conv2, bf16
            ys.append(y)
        mean, var = _block_bn_stats(ys, mask, nb * H * W)
        stat_ref[0] = jnp.concatenate([mean, var], axis=1)
    return kernel


def _make_residual_kernel(Wp, P):
    def kernel(y2_ref, scale_ref, shift_ref, xflat_ref, out_ref):
        scale, shift = scale_ref[...], shift_ref[...]        # (C, 1) f32
        y2 = y2_ref[...].astype(jnp.float32)                 # (NB, C, P)
        # identity shortcut = interior of the flat-padded input
        shortcut = xflat_ref[:, :, Wp + 1: Wp + 1 + P].astype(jnp.float32)
        out_ref[...] = jnp.maximum(y2 * scale + shift + shortcut,
                                   0.0).astype(out_ref.dtype)
    return kernel


# ----------------------------------------------------------------------------
# host-side stat combination (tiny, per-channel)
# ----------------------------------------------------------------------------
def _finalize_bn(block_stats, gamma, beta):
    """Combine equal-sized per-block centred (mean, var) into batch statistics
    and fold the BN affine into per-channel (scale, shift)."""
    mean_b = block_stats[:, :, 0]                            # (G, C)
    var_b = block_stats[:, :, 1]                             # (G, C)
    mean = jnp.mean(mean_b, axis=0)                          # (C,)
    var = jnp.mean(var_b, axis=0) + jnp.mean((mean_b - mean) ** 2, axis=0)
    scale = gamma.astype(jnp.float32) / jnp.sqrt(var + BN_EPS)
    shift = beta.astype(jnp.float32) - mean * scale
    return scale.reshape(-1, 1), shift.reshape(-1, 1)        # (C, 1) each


# ----------------------------------------------------------------------------
# wrapper
# ----------------------------------------------------------------------------
def basic_block(x_nchw, params, *, images_per_step=2):
    """BasicBlock forward: conv-bn-relu-conv-bn + identity shortcut + relu.

    PyTorch conventions at the boundary: x is NCHW f32, conv weights OIHW.
    `images_per_step` is the per-grid-step tile; tune ~4-8 on v7x, up to ~16
    on v5e/v6e at real ResNet shapes.
    """
    x = x_nchw.astype(jnp.float32)
    N, C, H, W = x.shape
    NB = images_per_step
    assert N % NB == 0, "images_per_step must divide the batch"
    G = N // NB
    Wp = W + 2                       # padded row width
    P = H * Wp                       # flat pixels / image (incl. 2 fold-over lanes/row)
    Lp = (H + 2) * Wp + 2            # flat-padded image length

    # Transposed, flat-padded, bf16 activation layout: (N, C, Lp).
    xpad = jnp.pad(x, ((0, 0), (0, 0), (1, 1), (1, 1)))
    xflat = jnp.pad(xpad.reshape(N, C, (H + 2) * Wp),
                    ((0, 0), (0, 0), (0, 2))).astype(jnp.bfloat16)

    # Valid-lane mask: lanes with (p mod Wp) >= W are fold-over garbage.
    valid_f = ((jnp.arange(P, dtype=jnp.int32) % Wp) < W)
    valid_f = valid_f.astype(jnp.float32).reshape(1, P)

    def prep_w(w_oihw):
        cout, cin = w_oihw.shape[0], w_oihw.shape[1]
        # OIHW -> (O, kh, kw, I) -> (Cout, 9*Cin); K order matches _im2col_flat.
        return (jnp.transpose(w_oihw, (0, 2, 3, 1))
                .reshape(cout, 9 * cin).astype(jnp.bfloat16))

    w1t, w2t = prep_w(params["w1"]), prep_w(params["w2"])

    parallel = pltpu.CompilerParams(dimension_semantics=("parallel",))
    act_block = pl.BlockSpec((NB, C, P), lambda i: (i, 0, 0))
    pad_block = pl.BlockSpec((NB, C, Lp), lambda i: (i, 0, 0))
    stat_block = pl.BlockSpec((1, C, 2), lambda i: (i, 0, 0))

    def full_spec(shape):
        return pl.BlockSpec(shape, lambda i: (0,) * len(shape))

    # --- pass 1: conv1 (raw) + per-block bn1 statistics ----------------------
    y1, st1 = pl.pallas_call(
        _make_conv1_kernel(H, W, Wp, P),
        grid=(G,),
        in_specs=[pad_block, full_spec((C, 9 * C)), full_spec((1, P))],
        out_specs=[act_block, stat_block],
        out_shape=[jax.ShapeDtypeStruct((N, C, P), jnp.bfloat16),
                   jax.ShapeDtypeStruct((G, C, 2), jnp.float32)],
        compiler_params=parallel,
    )(xflat, w1t, valid_f)
    scale1, shift1 = _finalize_bn(st1, params["g1"], params["b1"])

    # --- pass 2: bn1 affine + relu + conv2 (raw) + per-block bn2 statistics --
    y2, st2 = pl.pallas_call(
        _make_conv2_kernel(H, W, Wp, P, Lp),
        grid=(G,),
        in_specs=[act_block, full_spec((C, 1)), full_spec((C, 1)),
                  full_spec((C, 9 * C)), full_spec((1, P))],
        out_specs=[act_block, stat_block],
        out_shape=[jax.ShapeDtypeStruct((N, C, P), jnp.bfloat16),
                   jax.ShapeDtypeStruct((G, C, 2), jnp.float32)],
        scratch_shapes=[pltpu.VMEM((C, Lp), jnp.bfloat16)],
        compiler_params=parallel,
    )(y1, scale1, shift1, w2t, valid_f)
    scale2, shift2 = _finalize_bn(st2, params["g2"], params["b2"])

    # --- pass 3: bn2 affine + identity shortcut + relu -----------------------
    out_t = pl.pallas_call(
        _make_residual_kernel(Wp, P),
        grid=(G,),
        in_specs=[act_block, full_spec((C, 1)), full_spec((C, 1)), pad_block],
        out_specs=act_block,
        out_shape=jax.ShapeDtypeStruct((N, C, P), jnp.float32),
        compiler_params=parallel,
    )(y2, scale2, shift2, xflat)

    # Drop the 2 fold-over lanes per row: (N, C, P) -> (N, C, H, W) == NCHW.
    return out_t.reshape(N, C, H, Wp)[:, :, :, :W]


# ----------------------------------------------------------------------------
# plain-JAX reference (mirrors the PyTorch forward, f32 everywhere)
# ----------------------------------------------------------------------------
def basic_block_reference(x_nchw, params):
    def conv(x, w):
        return jax.lax.conv_general_dilated(
            x, w, window_strides=(1, 1), padding=((1, 1), (1, 1)),
            dimension_numbers=("NCHW", "OIHW", "NCHW"),
            precision=jax.lax.Precision.HIGHEST)

    def bn(x, g, b):
        mean = jnp.mean(x, axis=(0, 2, 3), keepdims=True)
        var = jnp.mean((x - mean) ** 2, axis=(0, 2, 3), keepdims=True)
        xn = (x - mean) / jnp.sqrt(var + BN_EPS)
        return xn * g.reshape(1, -1, 1, 1) + b.reshape(1, -1, 1, 1)

    out = jax.nn.relu(bn(conv(x_nchw, params["w1"]), params["g1"], params["b1"]))
    out = bn(conv(out, params["w2"]), params["g2"], params["b2"])
    return jax.nn.relu(out + x_nchw)                         # identity shortcut


if __name__ == "__main__":
    # First CIFAR-ResNet stage config at small spatial size:
    # batch=8, in_planes=planes=16, 16x16 spatial, stride=1, identity shortcut.
    N, C, H, W = 8, 16, 16, 16
    key = jax.random.PRNGKey(0)
    kx, k1, k2, kg1, kb1, kg2, kb2 = jax.random.split(key, 7)

    x = jax.random.normal(kx, (N, C, H, W), jnp.float32)
    params = {
        "w1": 0.1 * jax.random.normal(k1, (C, C, 3, 3), jnp.float32),  # OIHW
        "w2": 0.1 * jax.random.normal(k2, (C, C, 3, 3), jnp.float32),  # OIHW
        "g1": 1.0 + 0.1 * jax.random.normal(kg1, (C,), jnp.float32),
        "b1": 0.1 * jax.random.normal(kb1, (C,), jnp.float32),
        "g2": 1.0 + 0.1 * jax.random.normal(kg2, (C,), jnp.float32),
        "b2": 0.1 * jax.random.normal(kb2, (C,), jnp.float32),
    }

    out = jax.block_until_ready(basic_block(x, params, images_per_step=2))
    ref = jax.block_until_ready(basic_block_reference(x, params))
    assert out.shape == (N, C, H, W)

    # bf16 activations in HBM/VMEM + bf16 MXU operands (f32 accumulation) vs a
    # full-f32 HIGHEST-precision reference: tighter than the old 5e-2, with
    # margin for the extra bf16 storage the review recommended.
    if not jnp.allclose(out, ref, rtol=3e-2, atol=3e-2):
        max_err = float(jnp.max(jnp.abs(out - ref)))
        raise AssertionError(
            f"Pallas BasicBlock does not match reference (max abs err {max_err:.4f})")

    print("KERNEL_OK")
</pallas_src>

<mosaic_0001>
module attributes {stable_mosaic.version = 11 : i64} {
  func.func @kernel(%arg0: i32, %arg1: memref<2x16x326xbf16, #tpu.memory_space<vmem>>, %arg2: memref<16x144xbf16, #tpu.memory_space<vmem>>, %arg3: memref<1x288xf32, #tpu.memory_space<vmem>>, %arg4: memref<2x16x288xbf16, #tpu.memory_space<vmem>>, %arg5: memref<1x16x2xf32, #tpu.memory_space<vmem>>) attributes {dimension_semantics = [#tpu.dimension_semantics<parallel>], iteration_bounds = array<i64: 4>, scalar_prefetch = 0 : i64, scratch_operands = 0 : i64, tpu.core_type = #tpu.core_type<tc>, window_params = [{transform_indices = @transform_0, window_bounds = array<i64: 2, 16, 326>}, {pipeline_mode = #tpu.pipeline_mode<synchronous>, transform_indices = @transform_1, window_bounds = array<i64: 16, 144>}, {pipeline_mode = #tpu.pipeline_mode<synchronous>, transform_indices = @transform_2, window_bounds = array<i64: 1, 288>}, {transform_indices = @transform_3, window_bounds = array<i64: 2, 16, 288>}, {transform_indices = @transform_4, window_bounds = array<i64: 1, 16, 2>}]} {
    %c0 = arith.constant 0 : index
    %c0_0 = arith.constant 0 : index
    %0 = vector.load %arg2[%c0, %c0_0] : memref<16x144xbf16, #tpu.memory_space<vmem>>, vector<16x144xbf16>
    %c0_1 = arith.constant 0 : index
    %c0_2 = arith.constant 0 : index
    %1 = vector.load %arg3[%c0_1, %c0_2] : memref<1x288xf32, #tpu.memory_space<vmem>>, vector<1x288xf32>
    %c0_3 = arith.constant 0 : index
    %c0_4 = arith.constant 0 : index
    %c0_5 = arith.constant 0 : index
    %2 = vector.load %arg1[%c0_3, %c0_4, %c0_5] : memref<2x16x326xbf16, #tpu.memory_space<vmem>>, vector<1x16x326xbf16>
    %3 = vector.shape_cast %2 : vector<1x16x326xbf16> to vector<16x326xbf16>
    %4 = vector.extract_strided_slice %3 {offsets = [0, 0], sizes = [16, 288], strides = [1, 1]} : vector<16x326xbf16> to vector<16x288xbf16>
    %5 = vector.extract_strided_slice %3 {offsets = [0, 1], sizes = [16, 288], strides = [1, 1]} : vector<16x326xbf16> to vector<16x288xbf16>
    %6 = vector.extract_strided_slice %3 {offsets = [0, 2], sizes = [16, 288], strides = [1, 1]} : vector<16x326xbf16> to vector<16x288xbf16>
    %7 = vector.extract_strided_slice %3 {offsets = [0, 18], sizes = [16, 288], strides = [1, 1]} : vector<16x326xbf16> to vector<16x288xbf16>
    %8 = vector.extract_strided_slice %3 {offsets = [0, 19], sizes = [16, 288], strides = [1, 1]} : vector<16x326xbf16> to vector<16x288xbf16>
    %9 = vector.extract_strided_slice %3 {offsets = [0, 20], sizes = [16, 288], strides = [1, 1]} : vector<16x326xbf16> to vector<16x288xbf16>
    %10 = vector.extract_strided_slice %3 {offsets = [0, 36], sizes = [16, 288], strides = [1, 1]} : vector<16x326xbf16> to vector<16x288xbf16>
    %11 = vector.extract_strided_slice %3 {offsets = [0, 37], sizes = [16, 288], strides = [1, 1]} : vector<16x326xbf16> to vector<16x288xbf16>
    %12 = vector.extract_strided_slice %3 {offsets = [0, 38], sizes = [16, 288], strides = [1, 1]} : vector<16x326xbf16> to vector<16x288xbf16>
    %13 = tpu.concatenate %4, %5, %6, %7, %8, %9, %10, %11, %12 in 0 : vector<16x288xbf16>, vector<16x288xbf16>, vector<16x288xbf16>, vector<16x288xbf16>, vector<16x288xbf16>, vector<16x288xbf16>, vector<16x288xbf16>, vector<16x288xbf16>, vector<16x288xbf16> -> vector<144x288xbf16>
    %cst = arith.constant dense<0.000000e+00> : vector<16x288xf32>
    %14 = tpu.matmul %0, %13, %cst {dimension_numbers = #tpu.dot_dimension_numbers<[1], [0], [0], [1], [0, 0, 1, 1], [], []>} : vector<16x144xbf16>, vector<144x288xbf16>, vector<16x288xf32> -> vector<16x288xf32>
    %15 = arith.truncf %14 : vector<16x288xf32> to vector<16x288xbf16>
    %c0_6 = arith.constant 0 : index
    %c0_7 = arith.constant 0 : index
    %c0_8 = arith.constant 0 : index
    %16 = vector.load %arg4[%c0_6, %c0_7, %c0_8] : memref<2x16x288xbf16, #tpu.memory_space<vmem>>, vector<1x16x288xbf16>
    %17 = vector.shape_cast %16 : vector<1x16x288xbf16> to vector<16x288xbf16>
    %18 = vector.shape_cast %15 : vector<16x288xbf16> to vector<1x16x288xbf16>
    tpu.vector_store %arg4[%c0_6, %c0_7, %c0_8], %18 {strides = array<i32>} : memref<2x16x288xbf16, #tpu.memory_space<vmem>>, vector<1x16x288xbf16>,
    %c1 = arith.constant 1 : index
    %c0_9 = arith.constant 0 : index
    %c0_10 = arith.constant 0 : index
    %19 = vector.load %arg1[%c1, %c0_9, %c0_10] : memref<2x16x326xbf16, #tpu.memory_space<vmem>>, vector<1x16x326xbf16>
    %20 = vector.shape_cast %19 : vector<1x16x326xbf16> to vector<16x326xbf16>
    %21 = vector.extract_strided_slice %20 {offsets = [0, 0], sizes = [16, 288], strides = [1, 1]} : vector<16x326xbf16> to vector<16x288xbf16>
    %22 = vector.extract_strided_slice %20 {offsets = [0, 1], sizes = [16, 288], strides = [1, 1]} : vector<16x326xbf16> to vector<16x288xbf16>
    %23 = vector.extract_strided_slice %20 {offsets = [0, 2], sizes = [16, 288], strides = [1, 1]} : vector<16x326xbf16> to vector<16x288xbf16>
    %24 = vector.extract_strided_slice %20 {offsets = [0, 18], sizes = [16, 288], strides = [1, 1]} : vector<16x326xbf16> to vector<16x288xbf16>
    %25 = vector.extract_strided_slice %20 {offsets = [0, 19], sizes = [16, 288], strides = [1, 1]} : vector<16x326xbf16> to vector<16x288xbf16>
    %26 = vector.extract_strided_slice %20 {offsets = [0, 20], sizes = [16, 288], strides = [1, 1]} : vector<16x326xbf16> to vector<16x288xbf16>
    %27 = vector.extract_strided_slice %20 {offsets = [0, 36], sizes = [16, 288], strides = [1, 1]} : vector<16x326xbf16> to vector<16x288xbf16>
    %28 = vector.extract_strided_slice %20 {offsets = [0, 37], sizes = [16, 288], strides = [1, 1]} : vector<16x326xbf16> to vector<16x288xbf16>
    %29 = vector.extract_strided_slice %20 {offsets = [0, 38], sizes = [16, 288], strides = [1, 1]} : vector<16x326xbf16> to vector<16x288xbf16>
    %30 = tpu.concatenate %21, %22, %23, %24, %25, %26, %27, %28, %29 in 0 : vector<16x288xbf16>, vector<16x288xbf16>, vector<16x288xbf16>, vector<16x288xbf16>, vector<16x288xbf16>, vector<16x288xbf16>, vector<16x288xbf16>, vector<16x288xbf16>, vector<16x288xbf16> -> vector<144x288xbf16>
    %cst_11 = arith.constant dense<0.000000e+00> : vector<16x288xf32>
    %31 = tpu.matmul %0, %30, %cst_11 {dimension_numbers = #tpu.dot_dimension_numbers<[1], [0], [0], [1], [0, 0, 1, 1], [], []>} : vector<16x144xbf16>, vector<144x288xbf16>, vector<16x288xf32> -> vector<16x288xf32>
    %32 = arith.truncf %31 : vector<16x288xf32> to vector<16x288xbf16>
    %c1_12 = arith.constant 1 : index
    %c0_13 = arith.constant 0 : index
    %c0_14 = arith.constant 0 : index
    %33 = vector.load %arg4[%c1_12, %c0_13, %c0_14] : memref<2x16x288xbf16, #tpu.memory_space<vmem>>, vector<1x16x288xbf16>
    %34 = vector.shape_cast %33 : vector<1x16x288xbf16> to vector<16x288xbf16>
    %35 = vector.shape_cast %32 : vector<16x288xbf16> to vector<1x16x288xbf16>
    tpu.vector_store %arg4[%c1_12, %c0_13, %c0_14], %35 {strides = array<i32>} : memref<2x16x288xbf16, #tpu.memory_space<vmem>>, vector<1x16x288xbf16>,
    %36 = vector.broadcast %1 : vector<1x288xf32> to vector<16x288xf32>
    %37 = arith.mulf %14, %36 : vector<16x288xf32>
    %cst_15 = arith.constant dense<0.000000e+00> : vector<16xf32>
    %38 = vector.multi_reduction <add>, %37, %cst_15 [1] : vector<16x288xf32> to vector<16xf32>
    %39 = vector.shape_cast %38 : vector<16xf32> to vector<16x1xf32>
    %cst_16 = arith.constant 0.000000e+00 : f32
    %40 = vector.broadcast %cst_16 : f32 to vector<16x1xf32>
    %41 = arith.addf %40, %39 : vector<16x1xf32>
    %42 = vector.broadcast %1 : vector<1x288xf32> to vector<16x288xf32>
    %43 = arith.mulf %31, %42 : vector<16x288xf32>
    %cst_17 = arith.constant dense<0.000000e+00> : vector<16xf32>
    %44 = vector.multi_reduction <add>, %43, %cst_17 [1] : vector<16x288xf32> to vector<16xf32>
    %45 = vector.shape_cast %44 : vector<16xf32> to vector<16x1xf32>
    %46 = arith.addf %41, %45 : vector<16x1xf32>
    %cst_18 = arith.constant 0.001953125 : f32
    %47 = vector.broadcast %cst_18 : f32 to vector<16x1xf32>
    %48 = arith.mulf %46, %47 : vector<16x1xf32>
    %49 = vector.broadcast %48 : vector<16x1xf32> to vector<16x288xf32>
    %50 = arith.subf %14, %49 : vector<16x288xf32>
    %51 = arith.mulf %50, %50 : vector<16x288xf32>
    %52 = vector.broadcast %1 : vector<1x288xf32> to vector<16x288xf32>
    %53 = arith.mulf %51, %52 : vector<16x288xf32>
    %cst_19 = arith.constant dense<0.000000e+00> : vector<16xf32>
    %54 = vector.multi_reduction <add>, %53, %cst_19 [1] : vector<16x288xf32> to vector<16xf32>
    %55 = vector.shape_cast %54 : vector<16xf32> to vector<16x1xf32>
    %cst_20 = arith.constant 0.000000e+00 : f32
    %56 = vector.broadcast %cst_20 : f32 to vector<16x1xf32>
    %57 = arith.addf %56, %55 : vector<16x1xf32>
    %58 = vector.broadcast %48 : vector<16x1xf32> to vector<16x288xf32>
    %59 = arith.subf %31, %58 : vector<16x288xf32>
    %60 = arith.mulf %59, %59 : vector<16x288xf32>
    %61 = vector.broadcast %1 : vector<1x288xf32> to vector<16x288xf32>
    %62 = arith.mulf %60, %61 : vector<16x288xf32>
    %cst_21 = arith.constant dense<0.000000e+00> : vector<16xf32>
    %63 = vector.multi_reduction <add>, %62, %cst_21 [1] : vector<16x288xf32> to vector<16xf32>
    %64 = vector.shape_cast %63 : vector<16xf32> to vector<16x1xf32>
    %65 = arith.addf %57, %64 : vector<16x1xf32>
    %cst_22 = arith.constant 0.001953125 : f32
    %66 = vector.broadcast %cst_22 : f32 to vector<16x1xf32>
    %67 = arith.mulf %65, %66 : vector<16x1xf32>
    %68 = tpu.concatenate %48, %67 in 1 : vector<16x1xf32>, vector<16x1xf32> -> vector<16x2xf32>
    %c0_23 = arith.constant 0 : index
    %c0_24 = arith.constant 0 : index
    %c0_25 = arith.constant 0 : index
    %69 = vector.load %arg5[%c0_23, %c0_24, %c0_25] : memref<1x16x2xf32, #tpu.memory_space<vmem>>, vector<1x16x2xf32>
    %70 = vector.shape_cast %69 : vector<1x16x2xf32> to vector<16x2xf32>
    %71 = vector.shape_cast %68 : vector<16x2xf32> to vector<1x16x2xf32>
    tpu.vector_store %arg5[%c0_23, %c0_24, %c0_25], %71 {strides = array<i32>} : memref<1x16x2xf32, #tpu.memory_space<vmem>>, vector<1x16x2xf32>,
    return
  }
  func.func @transform_0(%arg0: i32) -> (i32, i32, i32) {
    %c0_i32 = arith.constant 0 : i32
    %c0_i32_0 = arith.constant 0 : i32
    %c0_i32_1 = arith.constant 0 : i32
    return %arg0, %c0_i32, %c0_i32_0 : i32, i32, i32
  }
  func.func @transform_1(%arg0: i32) -> (i32, i32) {
    %c0_i32 = arith.constant 0 : i32
    %c0_i32_0 = arith.constant 0 : i32
    %c0_i32_1 = arith.constant 0 : i32
    return %c0_i32, %c0_i32_0 : i32, i32
  }
  func.func @transform_2(%arg0: i32) -> (i32, i32) {
    %c0_i32 = arith.constant 0 : i32
    %c0_i32_0 = arith.constant 0 : i32
    %c0_i32_1 = arith.constant 0 : i32
    return %c0_i32, %c0_i32_0 : i32, i32
  }
  func.func @transform_3(%arg0: i32) -> (i32, i32, i32) {
    %c0_i32 = arith.constant 0 : i32
    %c0_i32_0 = arith.constant 0 : i32
    %c0_i32_1 = arith.constant 0 : i32
    return %arg0, %c0_i32, %c0_i32_0 : i32, i32, i32
  }
  func.func @transform_4(%arg0: i32) -> (i32, i32, i32) {
    %c0_i32 = arith.constant 0 : i32
    %c0_i32_0 = arith.constant 0 : i32
    %c0_i32_1 = arith.constant 0 : i32
    return %arg0, %c0_i32, %c0_i32_0 : i32, i32, i32
  }
}

</mosaic_0001>

<bundles_post_ra>
// kernel: tpu_custom_call.1
= control target key start
LH: loop header
LB: loop body
LE: loop exit
PB: predicated region body
PF: predicated region fallthrough
CT: control target
= control target key end

     0   :  { %10 = vsyncpa [#allocation3], 0  ;;  %s1731_s0 = inlined_call_operand.hbm [shape: bf16[8,16,326], index: 0, kind: input, shape index: {}]   ;;  %s1732_s1 = inlined_call_operand.hbm [shape: bf16[16,144], index: 1, kind: input, shape index: {}]   ;;  %s1733_s2 = inlined_call_operand.vmem [shape: f32[1,288], index: 2, kind: input, shape index: {}]   ;;  %s1734_s3 = inlined_call_operand.hbm [shape: bf16[8,16,288], index: 3, kind: output, shape index: {0}]   ;;  %s1735_s4 = inlined_call_operand.vmem [shape: f32[4,16,2], index: 4, kind: output, shape index: {1}]  }
   0x1   :  { %12 = vsyncpa [#allocation3 + $0x1], 0 }
   0x2   :  { %13 = vsyncpa [#allocation6], 0 }
   0x3   :  { %14 = vsyncpa [#allocation4], 0 }
   0x4   :  { %16 = vsyncpa [#allocation4 + $0x1], 0  ;;  %s1274_s15 = smov 0   ;;  %s1276_s16 = smov 0  }
   0x5   :  { %s1278_s17 = smov 0   ;;  %s1280_s18 = smov 0  }
   0x6 LB: > { %s1295_s19 = sadd.s32 4294967295, %s1229_s18   ;;  %s961_s20 = sadd.s32 4294967294, %s1229_s18   ;;  %s1229_s18 = sphi %s1280_s18, %s1754_s18   ;;  %s1225_s17 = sphi %s1278_s17, %s1753_s17   ;;  %s1221_s16 = sphi %s1276_s16, %s1752_s16   ;;  %s1217_s15 = sphi %s1274_s15, %s1751_s15  }
   0x7   : > { %p42_p0 = scmp.ne.s32.totalorder %s1221_s16, %s1217_s15  ;;  %p1736_p1 = scmp.eq.s32.totalorder %s1295_s19, 0 }
   0x8   : > { %p114_p3 = scmp.eq.s32.totalorder %s961_s20, 3  ;;  %p962_p5 = scmp.ge.s32.totalorder %s1229_s18, 1 }
   0x9   : > { %p1304_p4 = por %p1736_p1, %p42_p0  ;;  %p147_p7 = scmp.lt.s32.totalorder %s1229_s18, 5 }
   0xa   : > { %p1309_p6 = por %p114_p3, %p42_p0  ;;  %s1231_s24 = smov [#allocation5]  }
   0xb   : > { %s1739_s21 = scalar_select %p1304_p4, 1, 0 }
   0xc   : > { %s1740_s22 = scalar_select %p1309_p6, 1, 0 }
   0xd   : > { %p1314_p8 = pnand %p962_p5, %p147_p7  ;;  %s159_s25 = sshll.u32 %s1231_s24, 4  ;;  %s160_s25 = int_to_ptr.vmem [resolvable:$true] %s159_s25 }
   0xe   : > { %s1327_s27 = sadd.s32 1, %s1229_s18   ;;  %s29_s28 = sadd.s32 1, %s1225_s17 }
   0xf   : > { %s1741_s23 = scalar_select %p1314_p8, 1, 0 }
  0x10   : > { %p1026_p9 = pneg %p1314_p8  ;;  %s26_s29 = ssub.s32 %s1229_s18, %s1327_s27 }
  0x11   : > { %s1101_s6 = scalar_lea.hbm %s1732_s1, 256 }
  0x12   : > { %p1322_p10 = pnand %p1026_p9, %p1736_p1  ;;  %p1102_p11 = scmp.ne.s32.totalorder %s1732_s1, %s1101_s6 }
  0x13   : > { %p1108_p3 = scmp.lt.u32.totalorder %s1101_s6, %s1732_s1 }
  0x14   : > { %p1103_p12 = pneg %p1322_p10 }
  0x16   : > { %p1104_p13 = pnand %p1103_p12, %p1102_p11 }
  0x18   : > { %p1105_p0 = pneg %p1104_p13 }
  0x1a   : > { %p1110_p5 = pnand %p1108_p3, %p1105_p0 }
  0x1c   : > { %1113 = shalt.err (!%p1110_p5)
}
  0x1d   : > { %s1114_s11 = scalar_lea.vmem %s160_s25, 256  ;;  %p1122_p2 = scmp.lt.s32.totalorder %s160_s25, %s160_s25 }
  0x1e   : > { %p1115_p7 = scmp.ne.s32.totalorder %s160_s25, %s1114_s11  ;;  %p1123_p6 = scmp.lt.s32.totalorder %s1114_s11, %s1114_s11 }
  0x20   : > { %p1117_p9 = pnand %p1115_p7, %p1103_p12  ;;  %p1124_p4 = por %p1123_p6, %p1122_p2 }
  0x22   : > { %p1118_p1 = pneg %p1117_p9 }
  0x24   : > { %p1125_p8 = pnand %p1124_p4, %p1118_p1 }
  0x26   : > { %1128 = shalt.err (!%p1125_p8)
}
  0x27   : > { %s1232_s12 = smov 128   ;;  %s1233_s13 = smov 8  }
  0x28   : > { %1029 = dma.hbm_to_vmem [thread:$0]  (!%p1322_p10), %s1732_s1, 256, %s160_s25, [#allocation6], %s1232_s12, %s1232_s12, %s1233_s13  }
  0x29   : > { %p27_p11 = scmp.eq.s32.totalorder %s26_s29, 0  ;;  %p36_p2 = scmp.ne.s32.totalorder %s1225_s17, %s1221_s16 }
  0x2a   : > { %p37_p1 = scmp.eq.s32.totalorder %s1229_s18, 0  ;;  %p1039_p4 = scmp.lt.s32.totalorder %s1229_s18, 4 }
  0x2b   : > { %s1353_s24 = scalar_select %p27_p11, %s1225_s17, %s29_s28  }
  0x2c   : > { %p38_p6 = por %p37_p1, %p36_p2  ;;  %p1743_p8 = scmp.eq.s32.totalorder %s1295_s19, 3 }
  0x2d   : > { %s176_s5 = sand.u32 1, %s1225_s17   ;;  %s1015_s6 = smul.u32 768, %s1229_s18 }
  0x2e   : > { %p1357_p12 = por %p1743_p8, %p36_p2  ;;  %s1014_s7 = smul.u32 48, %s176_s5 }
  0x2f   : > { %s1366_s9 = scalar_lea.hbm %s1731_s0, %s1015_s6  ;;  %p1368_p10 = pnand %p1039_p4, %p38_p6 }
  0x30   : > { %s180_s28 = scalar_lea.vmem [#allocation2], %s1014_s7  ;;  %s1374_s10 = scalar_lea.sflag [#allocation3], %s176_s5 }
  0x31   : > { %s188_s29 = sshll.u32 %s180_s28, 4  ;;  %s1129_s11 = scalar_lea.hbm %s1366_s9, 768  ;;  %s1372_s29 = int_to_ptr.vmem [resolvable:$true] %s188_s29 }
  0x32   : > { %p1130_p13 = scmp.ne.s32.totalorder %s1366_s9, %s1129_s11  ;;  %p1131_p0 = pneg %p1368_p10 }
  0x33   : > { %s1134_s14 = scalar_lea.hbm %s1731_s0, 3072  ;;  %p1135_p7 = scmp.lt.u32.totalorder %s1366_s9, %s1731_s0 }
  0x34   : > { %p1132_p3 = pnand %p1131_p0, %p1130_p13  ;;  %p1136_p9 = scmp.lt.u32.totalorder %s1134_s14, %s1129_s11 }
  0x35   : > { %p1138_p2 = scmp.lt.u32.totalorder %s1129_s11, %s1366_s9 }
  0x36   : > { %p1133_p5 = pneg %p1132_p3  ;;  %p1137_p11 = por %p1136_p9, %p1135_p7 }
  0x38   : > { %p1139_p1 = por %p1138_p2, %p1137_p11 }
  0x3a   : > { %p1140_p4 = pnand %p1139_p1, %p1133_p5 }
  0x3c   : > { %1143 = shalt.err (!%p1140_p4)
}
  0x3d   : > { %s1144_s5 = scalar_lea.vmem %s1372_s29, 768  ;;  %s1234_s7 = smov [#allocation2]  }
  0x3e   : > { %p1145_p6 = scmp.ne.s32.totalorder %s1372_s29, %s1144_s5  ;;  %s1149_s26 = sshll.u32 %s1234_s7, 4  ;;  %s1150_s26 = int_to_ptr.vmem [resolvable:$false] %s1149_s26 }
  0x3f   : > { %s1151_s8 = scalar_lea.vmem %s1150_s26, 1536  ;;  %p1152_p3 = scmp.lt.s32.totalorder %s1372_s29, %s1150_s26 }
  0x40   : > { %p1147_p8 = pnand %p1145_p6, %p1131_p0  ;;  %p1153_p7 = scmp.lt.s32.totalorder %s1151_s8, %s1144_s5 }
  0x42   : > { %p1148_p13 = pneg %p1147_p8  ;;  %p1154_p9 = por %p1153_p7, %p1152_p3 }
  0x44   : > { %p1155_p11 = pnand %p1154_p9, %p1148_p13 }
  0x46   : > { %1158 = shalt.err (!%p1155_p11)
}
  0x47   : > { %s1235_s28 = smov 192   ;;  %s1236_s11 = smov 12  }
  0x48   : > { %1033 = dma.hbm_to_vmem [thread:$0]  (!%p1368_p10), %s1366_s9, 768, %s1372_s29, %s1374_s10, %s1235_s28, %s1235_s28, %s1236_s11  }
  0x49   : > { %p1746_p0 = scmp.ne.s32.totalorder %s1741_s23, 0 }
  0x4a   : > { %s1405_s12 = sand.u32 (!%p1746_p0), 1, %s1221_s16   ;;  %p1747_p5 = scmp.ne.s32.totalorder (!%p1746_p0), %s1739_s21, 0 }
  0x4b   : > { %200 = sbr.rel (%p1746_p0) target bundleno = 831 (0x33f), region = 32  ;;  %s203_s14 = scalar_lea.sflag (!%p1746_p0), [#allocation3], %s1405_s12 }
  0x4c   : > { %s1016_s13 = smul.u32 (!%p1746_p0), 48, %s1405_s12 }
  0x4e   : > { %s1411_s20 = scalar_lea.vmem (!%p1746_p0), [#allocation2], %s1016_s13 }
  0x52   : > { %1204 = dma.done.wait (%p1747_p5), %s203_s14, 768  }
  0x53   : > { %1206 = vsyncadd (%p1747_p5), %s203_s14, 4294966528  ;;  %p1748_p10 = scmp.eq.s32.totalorder %s1295_s19, 0 }
  0x55   : > { %1208 = dma.done.wait (%p1748_p10), [#allocation6], 256   ;;  %p1749_p2 = pmov %p1748_p10 }
  0x56   : > { %v1237_v0 = vmov 0   ;;  %v1090_v1 = vld [vmem:[%s1411_s20 + $0x4] ss:$12 sps:$4 sm:$0xff]   ;;  %v1092_v2 = vld [vmem:[%s1411_s20] ss:$12 sps:$4 sm:$0xff]   ;;  %s1238_s23 = smov 127  }
  0x57   : > { %1210 = vsyncadd (%p1749_p2), [#allocation6], 4294967040  ;;  %423 = vmatprep.subr.bf16.mxu1 %v1237_v0  ;;  %273 = vrot.lane.b32.xlu0 %v1090_v1, %s1238_s23  ;;  %v1093_v3 = vld [vmem:[%s1411_s20 + $0x8] ss:$12 sps:$4 sm:$0xff]   ;;  %s1239_s21 = smov 126   ;;  %s1240_s9 = smov 110  }
  0x58   : > { %380 = vmatprep.subr.bf16.mxu0 %v1090_v1  ;;  %271 = vrot.lane.b32.xlu1 %v1092_v2, %s1238_s23  ;;  %s1241_s25 = smov 109   ;;  %s1242_s29 = smov 108   ;;  %v1444_v4 = vld [vmem:[#allocation5 + $0x4] ss:$8 sps:$4 sm:$0xff]   ;;  %vm376_vm0 = vcmask 130048   ;;  %vm277_vm1 = vcmask 1039360  }
  0x59   : > { %381 = vmatpush1.bf16.msra.mxu0 %v1092_v2  ;;  %424 = vmatpush1.bf16.msra.mxu1 %v1093_v3  ;;  %s1243_s10 = smov 92   ;;  %s1244_s6 = smov 91   ;;  %v1454_v5 = vld [vmem:[%s1411_s20 + $0x1c] ss:$12 sps:$4 sm:$0xff]   ;;  %v1457_v6 = vld [vmem:[%s1411_s20 + $0x20] ss:$12 sps:$4 sm:$0xff]  }
  0x5a   : > { %425 = vmatprep.subr.bf16.mxu1 %v1237_v0  ;;  %978 = vmatprep.mubr.msk.bf16.mxu1 %vm376_vm0, %v1444_v4  ;;  %s1245_s5 = smov 90   ;;  %v1462_v7 = vld [vmem:[%s1411_s20 + $0x18] ss:$12 sps:$4 sm:$0xff]   ;;  %vm289_vm2 = vcmask 1031168   ;;  %vm301_vm3 = vcmask 900096   ;;  %vm313_vm4 = vcmask 891904  }
  0x5b   : > { %275 = vrot.lane.b32.xlu0 %v1093_v3, %s1238_s23  ;;  %977 = vmatprep.mubr.msk.bf16.mxu0 %vm376_vm0, %v1444_v4  ;;  %vm325_vm5 = vcmask 883712   ;;  %vm337_vm6 = vcmask 752640   ;;  %vm349_vm7 = vcmask 744448   ;;  %vm361_vm8 = vcmask 736256   ;;  %v1528_v45 = vld [vmem:[#allocation5] ss:$8 sps:$4 sm:$0xff]  }
  0x5c   : > { %285 = vrot.lane.b32.xlu1 %v1090_v1, %s1239_s21  ;;  %vm485_vm9 = vcmask 257024   ;;  %vm730_vm10 = vcmask 261120   ;;  %s1591_s8 = scalar_lea.vmem [#allocation7], %s1016_s13  ;;  %s1017_s11 = smul.u32 768, %s1295_s19 }
  0x5d   : > { %s850_s28 = sshll.u32 %s1591_s8, 4  ;;  %s1676_s28 = int_to_ptr.vmem [resolvable:$true] %s850_s28 }
  0x5e   : > { %s1681_s20 = scalar_lea.hbm %s1734_s3, %s1017_s11 }
  0x5f   : > { %287 = vrot.lane.b32.xlu0 %v1093_v3, %s1239_s21 }
  0x60   : > { %283 = vrot.lane.b32.xlu1 %v1092_v2, %s1239_s21 }
  0x63   : > { %297 = vrot.lane.b32.xlu0 %v1090_v1, %s1240_s9 }
  0x64   : > { %299 = vrot.lane.b32.xlu1 %v1093_v3, %s1240_s9 }
  0x67   : > { %295 = vrot.lane.b32.xlu0 %v1092_v2, %s1240_s9 }
  0x68   : > { %309 = vrot.lane.b32.xlu1 %v1090_v1, %s1241_s25 }
  0x6b   : > { %311 = vrot.lane.b32.xlu0 %v1093_v3, %s1241_s25 }
  0x6c   : > { %307 = vrot.lane.b32.xlu1 %v1092_v2, %s1241_s25 }
  0x6f   : > { %321 = vrot.lane.b32.xlu0 %v1090_v1, %s1242_s29 }
  0x70   : > { %323 = vrot.lane.b32.xlu1 %v1093_v3, %s1242_s29 }
  0x73   : > { %319 = vrot.lane.b32.xlu0 %v1092_v2, %s1242_s29 }
  0x74   : > { %333 = vrot.lane.b32.xlu1 %v1090_v1, %s1243_s10 }
  0x77   : > { %335 = vrot.lane.b32.xlu0 %v1093_v3, %s1243_s10 }
  0x78   : > { %331 = vrot.lane.b32.xlu1 %v1092_v2, %s1243_s10 }
  0x7b   : > { %345 = vrot.lane.b32.xlu0 %v1090_v1, %s1244_s6 }
  0x7c   : > { %347 = vrot.lane.b32.xlu1 %v1093_v3, %s1244_s6 }
  0x7f   : > { %343 = vrot.lane.b32.xlu0 %v1092_v2, %s1244_s6 }
  0x80   : > { %357 = vrot.lane.b32.xlu1 %v1090_v1, %s1245_s5 }
  0x83   : > { %359 = vrot.lane.b32.xlu0 %v1093_v3, %s1245_s5 }
  0x84   : > { %355 = vrot.lane.b32.xlu1 %v1092_v2, %s1245_s5 }
  0x87   : > { %512 = vrot.lane.b32.xlu0 %v1454_v5, %s1238_s23 }
  0x88   : > { %514 = vrot.lane.b32.xlu1 %v1457_v6, %s1238_s23 }
  0x8b   : > { %510 = vrot.lane.b32.xlu0 %v1462_v7, %s1238_s23  ;;  %s831_s23 = scalar_lea.sflag [#allocation4], %s1405_s12 }
  0x8c   : > { %523 = vrot.lane.b32.xlu1 %v1454_v5, %s1239_s21 }
  0x8f   : > { %525 = vrot.lane.b32.xlu0 %v1457_v6, %s1239_s21 }
  0x90   : > { %521 = vrot.lane.b32.xlu1 %v1462_v7, %s1239_s21  ;;  %s1159_s21 = scalar_lea.vmem %s1676_s28, 768 }
  0x91   : > { %p1160_p1 = scmp.ne.s32.totalorder %s1676_s28, %s1159_s21 }
  0x93   : > { %534 = vrot.lane.b32.xlu0 %v1454_v5, %s1240_s9  ;;  %p1161_p4 = pnand %p1160_p1, %p1357_p12 }
  0x94   : > { %536 = vrot.lane.b32.xlu1 %v1457_v6, %s1240_s9 }
  0x95   : > { %p1162_p6 = pneg %p1161_p4 }
  0x97   : > { %532 = vrot.lane.b32.xlu0 %v1462_v7, %s1240_s9  ;;  %s1246_s9 = smov [#allocation7]  }
  0x98   : > { %545 = vrot.lane.b32.xlu1 %v1454_v5, %s1241_s25 }
  0x9b   : > { %547 = vrot.lane.b32.xlu0 %v1457_v6, %s1241_s25 }
  0x9c   : > { %543 = vrot.lane.b32.xlu1 %v1462_v7, %s1241_s25  ;;  %s1163_s25 = sshll.u32 %s1246_s9, 4  ;;  %s1164_s25 = int_to_ptr.vmem [resolvable:$false] %s1163_s25 }
  0x9d   : > { %p1166_p8 = scmp.lt.s32.totalorder %s1676_s28, %s1164_s25 }
  0x9f   : > { %556 = vrot.lane.b32.xlu0 %v1454_v5, %s1242_s29 }
  0xa0   : > { %558 = vrot.lane.b32.xlu1 %v1457_v6, %s1242_s29 }
  0xa3   : > { %554 = vrot.lane.b32.xlu0 %v1462_v7, %s1242_s29  ;;  %s1165_s29 = scalar_lea.vmem %s1164_s25, 1536 }
  0xa4   : > { %567 = vrot.lane.b32.xlu1 %v1454_v5, %s1243_s10  ;;  %p1167_p13 = scmp.lt.s32.totalorder %s1165_s29, %s1159_s21 }
  0xa6   : > { %p1168_p3 = por %p1167_p13, %p1166_p8 }
  0xa7   : > { %569 = vrot.lane.b32.xlu0 %v1457_v6, %s1243_s10 }
  0xa8   : > { %565 = vrot.lane.b32.xlu1 %v1462_v7, %s1243_s10  ;;  %p1169_p7 = pnand %p1168_p3, %p1162_p6 }
  0xab   : > { %578 = vrot.lane.b32.xlu0 %v1454_v5, %s1244_s6 }
  0xac   : > { %580 = vrot.lane.b32.xlu1 %v1457_v6, %s1244_s6 }
  0xaf   : > { %576 = vrot.lane.b32.xlu0 %v1462_v7, %s1244_s6 }
  0xb0   : > { %589 = vrot.lane.b32.xlu1 %v1454_v5, %s1245_s5 }
  0xb3   : > { %591 = vrot.lane.b32.xlu0 %v1457_v6, %s1245_s5 }
  0xb4   : > { %587 = vrot.lane.b32.xlu1 %v1462_v7, %s1245_s5 }
  0xc9   : > { %v274_v8 = vpop.permute.xlu0 %273 }
  0xca   : > { %v272_v9 = vpop.permute.xlu1 %271 }
  0xcb   : > { %v278_v13 = vsel %vm277_vm1, %v272_v9, %v274_v8 }
  0xcd   : > { %v276_v10 = vpop.permute.xlu0 %275 }
  0xce   : > { %v286_v11 = vpop.permute.xlu1 %285  ;;  %426 = vmatpush1.bf16.msra.mxu1 %v276_v10  ;;  %v279_v12 = vsel %vm277_vm1, %v274_v8, %v276_v10 }
  0xcf   : > { %382 = vmatprep.subr.bf16.mxu0 %v279_v12  ;;  %427 = vmatprep.subr.bf16.mxu1 %v1237_v0 }
  0xd0   : > { %383 = vmatpush1.bf16.msra.mxu0 %v278_v13 }
  0xd1   : > { %v288_v14 = vpop.permute.xlu0 %287 }
  0xd2   : > { %v284_v15 = vpop.permute.xlu1 %283  ;;  %428 = vmatpush1.bf16.msra.mxu1 %v288_v14  ;;  %v291_v16 = vsel %vm289_vm2, %v286_v11, %v288_v14 }
  0xd3   : > { %384 = vmatprep.subr.bf16.mxu0 %v291_v16  ;;  %v290_v17 = vsel %vm289_vm2, %v284_v15, %v286_v11  ;;  %429 = vmatprep.subr.bf16.mxu1 %v1237_v0 }
  0xd4   : > { %385 = vmatpush1.bf16.msra.mxu0 %v290_v17 }
  0xd5   : > { %v298_v18 = vpop.permute.xlu0 %297 }
  0xd6   : > { %v300_v19 = vpop.permute.xlu1 %299 }
  0xd7   : > { %v303_v20 = vsel %vm301_vm3, %v298_v18, %v300_v19  ;;  %430 = vmatpush1.bf16.msra.mxu1 %v300_v19 }
  0xd8   : > { %386 = vmatprep.subr.bf16.mxu0 %v303_v20  ;;  %431 = vmatprep.subr.bf16.mxu1 %v1237_v0 }
  0xd9   : > { %v296_v21 = vpop.permute.xlu0 %295 }
  0xda   : > { %v310_v22 = vpop.permute.xlu1 %309  ;;  %v302_v23 = vsel %vm301_vm3, %v296_v21, %v298_v18 }
  0xdb   : > { %387 = vmatpush1.bf16.msra.mxu0 %v302_v23 }
  0xdd   : > { %v312_v24 = vpop.permute.xlu0 %311 }
  0xde   : > { %v308_v25 = vpop.permute.xlu1 %307  ;;  %432 = vmatpush1.bf16.msra.mxu1 %v312_v24  ;;  %v315_v26 = vsel %vm313_vm4, %v310_v22, %v312_v24 }
  0xdf   : > { %388 = vmatprep.subr.bf16.mxu0 %v315_v26  ;;  %v314_v27 = vsel %vm313_vm4, %v308_v25, %v310_v22  ;;  %433 = vmatprep.subr.bf16.mxu1 %v1237_v0  ;;  %v708_v26 = vlaneseq }
  0xe0   : > { %389 = vmatpush1.bf16.msra.mxu0 %v314_v27 }
  0xe1   : > { %v322_v28 = vpop.permute.xlu0 %321 }
  0xe2   : > { %v324_v29 = vpop.permute.xlu1 %323 }
  0xe3   : > { %v327_v30 = vsel %vm325_vm5, %v322_v28, %v324_v29  ;;  %434 = vmatpush1.bf16.msra.mxu1 %v324_v29 }
  0xe4   : > { %390 = vmatprep.subr.bf16.mxu0 %v327_v30  ;;  %435 = vmatprep.subr.bf16.mxu1 %v1237_v0 }
  0xe5   : > { %v320_v31 = vpop.permute.xlu0 %319 }
  0xe6   : > { %v334_v32 = vpop.permute.xlu1 %333  ;;  %v326_v33 = vsel %vm325_vm5, %v320_v31, %v322_v28  ;;  %v250_v28 = vld [vmem:[%s1733_s2] sm:$0x7] }
  0xe7   : > { %391 = vmatpush1.bf16.msra.mxu0 %v326_v33 }
  0xe9   : > { %v336_v34 = vpop.permute.xlu0 %335 }
  0xea   : > { %v332_v35 = vpop.permute.xlu1 %331  ;;  %436 = vmatpush1.bf16.msra.mxu1 %v336_v34  ;;  %v339_v36 = vsel %vm337_vm6, %v334_v32, %v336_v34 }
  0xeb   : > { %392 = vmatprep.subr.bf16.mxu0 %v339_v36  ;;  %v338_v37 = vsel %vm337_vm6, %v332_v35, %v334_v32  ;;  %437 = vmatprep.subr.bf16.mxu1 %v1237_v0 }
  0xec   : > { %393 = vmatpush1.bf16.msra.mxu0 %v338_v37 }
  0xed   : > { %v346_v38 = vpop.permute.xlu0 %345 }
  0xee   : > { %v348_v39 = vpop.permute.xlu1 %347 }
  0xef   : > { %v351_v40 = vsel %vm349_vm7, %v346_v38, %v348_v39  ;;  %438 = vmatpush1.bf16.msra.mxu1 %v348_v39 }
  0xf0   : > { %394 = vmatprep.subr.bf16.mxu0 %v351_v40  ;;  %439 = vmatprep.subr.bf16.mxu1 %v1237_v0 }
  0xf1   : > { %v344_v41 = vpop.permute.xlu0 %343 }
  0xf2   : > { %v358_v42 = vpop.permute.xlu1 %357  ;;  %v350_v43 = vsel %vm349_vm7, %v344_v41, %v346_v38 }
  0xf3   : > { %395 = vmatpush1.bf16.msra.mxu0 %v350_v43 }
  0xf5   : > { %v360_v44 = vpop.permute.xlu0 %359 }
  0xf6   : > { %v356_v46 = vpop.permute.xlu1 %355  ;;  %440 = vmatpush1.bf16.msra.mxu1 %v360_v44  ;;  %v363_v47 = vsel %vm361_vm8, %v358_v42, %v360_v44 }
  0xf7   : > { %396 = vmatprep.subr.bf16.mxu0 %v363_v47  ;;  %v362_v48 = vsel %vm361_vm8, %v356_v46, %v358_v42  ;;  %641 = vmatprep.subr.bf16.mxu1 %v1237_v0 }
  0xf8   : > { %397 = vmatpush1.bf16.msra.mxu0 %v362_v48 }
  0xf9   : > { %v513_v49 = vpop.permute.xlu0 %512  ;;  %456 = vmatmul.mubr.bf16.vlgmr.msra.gmra.mrb[0].mxu1 %v1528_v45  ;;  %598 = vmatprep.subr.bf16.mxu0 %v1454_v5 }
  0xfa   : > { %v515_v50 = vpop.permute.xlu1 %514  ;;  %642 = vmatpush1.bf16.msra.mxu1 %v1457_v6  ;;  %991 = vmatprep.mubr.msk.bf16.mxu1 %vm376_vm0, %v1444_v4 }
  0xfb   : > { %413 = vmatmul.mubr.bf16.vlgmr.msra.gmra.mrb[0].mxu0 %v1528_v45  ;;  %643 = vmatprep.subr.bf16.mxu1 %v1237_v0  ;;  %v517_v51 = vsel %vm277_vm1, %v513_v49, %v515_v50 }
  0xfc   : > { %599 = vmatpush1.bf16.msra.mxu0 %v1462_v7  ;;  %990 = vmatprep.mubr.msk.bf16.mxu0 %vm376_vm0, %v1444_v4 }
  0xfd   : > { %v511_v52 = vpop.permute.xlu0 %510  ;;  %600 = vmatprep.subr.bf16.mxu0 %v517_v51 }
  0xfe   : > { %v516_v53 = vsel %vm277_vm1, %v511_v52, %v513_v49  ;;  %v524_v54 = vpop.permute.xlu1 %523  ;;  %644 = vmatpush1.bf16.msra.mxu1 %v515_v50 }
  0xff   : > { %645 = vmatprep.subr.bf16.mxu1 %v1237_v0 }
 0x100   : > { %601 = vmatpush1.bf16.msra.mxu0 %v516_v53 }
 0x101   : > { %v526_v55 = vpop.permute.xlu0 %525 }
 0x102   : > { %v522_v56 = vpop.permute.xlu1 %521  ;;  %646 = vmatpush1.bf16.msra.mxu1 %v526_v55  ;;  %v528_v57 = vsel %vm289_vm2, %v524_v54, %v526_v55 }
 0x103   : > { %v527_v58 = vsel %vm289_vm2, %v522_v56, %v524_v54  ;;  %602 = vmatprep.subr.bf16.mxu0 %v528_v57  ;;  %647 = vmatprep.subr.bf16.mxu1 %v1237_v0 }
 0x104   : > { %603 = vmatpush1.bf16.msra.mxu0 %v527_v58 }
 0x105   : > { %v535_v59 = vpop.permute.xlu0 %534 }
 0x106   : > { %v537_v60 = vpop.permute.xlu1 %536 }
 0x107   : > { %v539_v61 = vsel %vm301_vm3, %v535_v59, %v537_v60  ;;  %648 = vmatpush1.bf16.msra.mxu1 %v537_v60 }
 0x108   : > { %604 = vmatprep.subr.bf16.mxu0 %v539_v61  ;;  %649 = vmatprep.subr.bf16.mxu1 %v1237_v0 }
 0x109   : > { %v533_v62 = vpop.permute.xlu0 %532 }
 0x10a   : > { %v538_v63 = vsel %vm301_vm3, %v533_v62, %v535_v59  ;;  %v546_v1 = vpop.permute.xlu1 %545 }
 0x10b   : > { %605 = vmatpush1.bf16.msra.mxu0 %v538_v63 }
 0x10d   : > { %v548_v2 = vpop.permute.xlu0 %547 }
 0x10e   : > { %v544_v3 = vpop.permute.xlu1 %543  ;;  %650 = vmatpush1.bf16.msra.mxu1 %v548_v2  ;;  %v550_v4 = vsel %vm313_vm4, %v546_v1, %v548_v2 }
 0x10f   : > { %v549_v5 = vsel %vm313_vm4, %v544_v3, %v546_v1  ;;  %606 = vmatprep.subr.bf16.mxu0 %v550_v4  ;;  %651 = vmatprep.subr.bf16.mxu1 %v1237_v0 }
 0x110   : > { %607 = vmatpush1.bf16.msra.mxu0 %v549_v5 }
 0x111   : > { %v557_v6 = vpop.permute.xlu0 %556 }
 0x112   : > { %v559_v7 = vpop.permute.xlu1 %558 }
 0x113   : > { %v561_v8 = vsel %vm325_vm5, %v557_v6, %v559_v7  ;;  %652 = vmatpush1.bf16.msra.mxu1 %v559_v7 }
 0x114   : > { %608 = vmatprep.subr.bf16.mxu0 %v561_v8  ;;  %653 = vmatprep.subr.bf16.mxu1 %v1237_v0 }
 0x115   : > { %v555_v9 = vpop.permute.xlu0 %554 }
 0x116   : > { %v560_v10 = vsel %vm325_vm5, %v555_v9, %v557_v6  ;;  %v568_v11 = vpop.permute.xlu1 %567 }
 0x117   : > { %609 = vmatpush1.bf16.msra.mxu0 %v560_v10 }
 0x119   : > { %v570_v12 = vpop.permute.xlu0 %569 }
 0x11a   : > { %v566_v13 = vpop.permute.xlu1 %565  ;;  %654 = vmatpush1.bf16.msra.mxu1 %v570_v12  ;;  %v572_v14 = vsel %vm337_vm6, %v568_v11, %v570_v12 }
 0x11b   : > { %v571_v15 = vsel %vm337_vm6, %v566_v13, %v568_v11  ;;  %610 = vmatprep.subr.bf16.mxu0 %v572_v14  ;;  %655 = vmatprep.subr.bf16.mxu1 %v1237_v0 }
 0x11c   : > { %611 = vmatpush1.bf16.msra.mxu0 %v571_v15 }
 0x11d   : > { %v579_v16 = vpop.permute.xlu0 %578 }
 0x11e   : > { %v581_v17 = vpop.permute.xlu1 %580 }
 0x11f   : > { %v583_v18 = vsel %vm349_vm7, %v579_v16, %v581_v17  ;;  %656 = vmatpush1.bf16.msra.mxu1 %v581_v17 }
 0x120   : > { %612 = vmatprep.subr.bf16.mxu0 %v583_v18  ;;  %657 = vmatprep.subr.bf16.mxu1 %v1237_v0  ;;  %v709_v0 = vshrl.u32 %v708_v26, 7 }
 0x121   : > { %v577_v19 = vpop.permute.xlu0 %576 }
 0x122   : > { %v582_v20 = vsel %vm349_vm7, %v577_v19, %v579_v16  ;;  %v590_v21 = vpop.permute.xlu1 %589  ;;  %v718_v27 = vsub.s32 2, %v709_v0  ;;  %v710_v29 = vsub.s32 0, %v709_v0  ;;  %v714_v30 = vsub.s32 1, %v709_v0 }
 0x123   : > { %613 = vmatpush1.bf16.msra.mxu0 %v582_v20 }
 0x124   : > { %v1571_v31 = vrot.slane %v250_v28, %v718_v27  ;;  %v1573_v32 = vrot.slane %v250_v28, %v710_v29  ;;  %v1575_v33 = vrot.slane %v250_v28, %v714_v30 }
 0x125   : > { %v592_v22 = vpop.permute.xlu0 %591 }
 0x126   : > { %v588_v23 = vpop.permute.xlu1 %587  ;;  %658 = vmatpush1.bf16.msra.mxu1 %v592_v22  ;;  %v594_v24 = vsel %vm361_vm8, %v590_v21, %v592_v22 }
 0x127   : > { %v593_v25 = vsel %vm361_vm8, %v588_v23, %v590_v21  ;;  %614 = vmatprep.subr.bf16.mxu0 %v594_v24 }
 0x128   : > { %615 = vmatpush1.bf16.msra.mxu0 %v593_v25 }
 0x129   : > { %674 = vmatmul.mubr.bf16.vlgmr.msra.gmra.mrb[4].mxu1 %v1528_v45 }
 0x12b   : > { %631 = vmatmul.mubr.bf16.vlgmr.msra.gmra.mrb[4].mxu0 %v1528_v45 }
 0x1cc   : > { %v1577_v34 = vpop.f32.mrb[0].mxu1 }
 0x1cd   : > { %v1007_v35 = vpack.c.bf16 %v1577_v34, %v1577_v34  ;;  %v725_v36 = vmul.f32 %v1571_v31, %v1577_v34  ;;  %v459_v37 = vpop.f32.mrb[1].mxu1 }
 0x1ce   : > { %v1583_v38 = vpop.f32.mrb[0].mxu0  ;;  %v1585_v39 = vpop.f32.mrb[2].mxu1 }
 0x1cf   : > { %v723_v40 = vmul.f32 %v1573_v32, %v1583_v38  ;;  %v416_v41 = vpop.f32.mrb[1].mxu0  ;;  %486 = vst.msk [vmem:[%s1591_s8 + $0x8] sm:$0xf] %vm485_vm9, %v1007_v35  ;;  %v1009_v42 = vpack.c.bf16 %v1585_v39, %v1585_v39  ;;  %v728_v43 = vmul.f32 %v1571_v31, %v1585_v39  ;;  %v462_v44 = vpop.f32.mrb[3].mxu1  ;;  %v731_v50 = vsel %vm730_vm10, %v725_v36, 0.0 }
 0x1d0   : > { %v1006_v45 = vpack.c.bf16 %v416_v41, %v1583_v38  ;;  %v724_v46 = vmul.f32 %v1575_v33, %v416_v41  ;;  %v1601_v47 = vpop.f32.mrb[2].mxu0 }
 0x1d1   : > { %v726_v48 = vmul.f32 %v1573_v32, %v1601_v47  ;;  %v1605_v49 = vpop.f32.mrb[3].mxu0  ;;  %488 = vst.msk [vmem:[%s1591_s8 + $0x14] sm:$0xf] %vm485_vm9, %v1009_v42  ;;  %v736_v54 = vsel %vm730_vm10, %v728_v43, 0.0 }
 0x1d2   : > { %484 = vst [vmem:[%s1591_s8] sm:$0xff] %v1006_v45  ;;  %v1008_v51 = vpack.c.bf16 %v1605_v49, %v1601_v47  ;;  %v727_v52 = vmul.f32 %v1575_v33, %v1605_v49  ;;  %v729_v53 = vadd.f32 %v724_v46, %v723_v40 }
 0x1d4   : > { %487 = vst [vmem:[%s1591_s8 + $0xc] sm:$0xff] %v1008_v51  ;;  %v732_v55 = vadd.f32 %v731_v50, %v729_v53  ;;  %v735_v56 = vadd.f32 %v727_v52, %v726_v48 }
 0x1d6   : > { %733 = vadd.xlane.f32.xlu0 %v732_v55  ;;  %v737_v57 = vadd.f32 %v736_v54, %v735_v56 }
 0x1d8   : > { %738 = vadd.xlane.f32.xlu1 %v737_v57 }
 0x1fc   : > { %v675_v58 = vpop.f32.mrb[4].mxu1 }
 0x1fd   : > { %v1011_v59 = vpack.c.bf16 %v675_v58, %v675_v58  ;;  %v744_v60 = vmul.f32 %v1571_v31, %v675_v58  ;;  %v677_v61 = vpop.f32.mrb[5].mxu1 }
 0x1fe   : > { %v632_v62 = vpop.f32.mrb[4].mxu0  ;;  %v1618_v63 = vpop.f32.mrb[6].mxu1 }
 0x1ff   : > { %997 = vst.msk [vmem:[%s1591_s8 + $0x20] sm:$0xf] %vm485_vm9, %v1011_v59  ;;  %v742_v1 = vmul.f32 %v1573_v32, %v632_v62  ;;  %v634_v2 = vpop.f32.mrb[5].mxu0  ;;  %v1013_v3 = vpack.c.bf16 %v1618_v63, %v1618_v63  ;;  %v680_v4 = vpop.f32.mrb[7].mxu1  ;;  %v747_v8 = vmul.f32 %v1571_v31, %v1618_v63  ;;  %v749_v11 = vsel %vm730_vm10, %v744_v60, 0.0 }
 0x200   : > { %v1010_v5 = vpack.c.bf16 %v634_v2, %v632_v62  ;;  %v743_v6 = vmul.f32 %v1575_v33, %v634_v2  ;;  %v636_v7 = vpop.f32.mrb[6].mxu0 }
 0x201   : > { %999 = vst.msk [vmem:[%s1591_s8 + $0x2c] sm:$0xf] %vm485_vm9, %v1013_v3  ;;  %v745_v9 = vmul.f32 %v1573_v32, %v636_v7  ;;  %v638_v10 = vpop.f32.mrb[7].mxu0  ;;  %v754_v17 = vsel %vm730_vm10, %v747_v8, 0.0 }
 0x202   : > { %996 = vst [vmem:[%s1591_s8 + $0x18] sm:$0xff] %v1010_v5  ;;  %v1012_v12 = vpack.c.bf16 %v638_v10, %v636_v7  ;;  %v746_v13 = vmul.f32 %v1575_v33, %v638_v10  ;;  %v748_v14 = vadd.f32 %v743_v6, %v742_v1 }
 0x204   : > { %998 = vst [vmem:[%s1591_s8 + $0x24] sm:$0xff] %v1012_v12  ;;  %v750_v15 = vadd.f32 %v749_v11, %v748_v14  ;;  %v753_v16 = vadd.f32 %v746_v13, %v745_v9 }
 0x206   : > { %751 = vadd.xlane.f32.xlu0 %v750_v15  ;;  %v755_v18 = vadd.f32 %v754_v17, %v753_v16 }
 0x20a   : > { %756 = vadd.xlane.f32.xlu0 %v755_v18 }
 0x263   : > { %v734_v19 = vpop.xlane.xlu0 %733 }
 0x265   : > { %v739_v23 = vpop.xlane.xlu1 %738 }
 0x293   : > { %v752_v20 = vpop.xlane.xlu0 %751 }
 0x294   : > { %v758_v21 = vadd.f32 %v752_v20, %v734_v19 }
 0x296   : > { %v1636_v22 = vmul.f32 0.001953125, %v758_v21 }
 0x297   : > { %v757_v24 = vpop.xlane.xlu0 %756 }
 0x298   : > { %v759_v25 = vadd.f32 %v757_v24, %v739_v23  ;;  %v762_v26 = vsub.f32 %v1583_v38, %v1636_v22  ;;  %v763_v0 = vsub.f32 %v416_v41, %v1636_v22  ;;  %v764_v27 = vsub.f32 %v1577_v34, %v1636_v22 }
 0x299   : > { %v792_v28 = vsub.f32 %v632_v62, %v1636_v22  ;;  %v793_v29 = vsub.f32 %v634_v2, %v1636_v22  ;;  %v794_v30 = vsub.f32 %v675_v58, %v1636_v22 }
 0x29a   : > { %v1646_v35 = vmul.f32 0.001953125, %v759_v25  ;;  %v768_v36 = vmul.f32 %v762_v26, %v762_v26  ;;  %v769_v37 = vmul.f32 %v763_v0, %v763_v0  ;;  %v770_v40 = vmul.f32 %v764_v27, %v764_v27 }
 0x29b   : > { %v798_v42 = vmul.f32 %v792_v28, %v792_v28  ;;  %v799_v43 = vmul.f32 %v793_v29, %v793_v29  ;;  %v800_v44 = vmul.f32 %v794_v30, %v794_v30 }
 0x29c   : > { %v774_v38 = vmul.f32 %v768_v36, %v1573_v32  ;;  %v775_v41 = vmul.f32 %v769_v37, %v1575_v33  ;;  %v776_v34 = vmul.f32 %v770_v40, %v1571_v31  ;;  %v765_v45 = vsub.f32 %v1601_v47, %v1646_v35 }
 0x29d   : > { %v804_v46 = vmul.f32 %v798_v42, %v1573_v32  ;;  %v805_v48 = vmul.f32 %v799_v43, %v1575_v33  ;;  %v806_v50 = vmul.f32 %v800_v44, %v1571_v31  ;;  %v766_v51 = vsub.f32 %v1605_v49, %v1646_v35 }
 0x29e   : > { %v780_v52 = vadd.f32 %v775_v41, %v774_v38  ;;  %v781_v53 = vsel %vm730_vm10, %v776_v34, 0.0  ;;  %v767_v54 = vsub.f32 %v1585_v39, %v1646_v35  ;;  %v771_v55 = vmul.f32 %v765_v45, %v765_v45 }
 0x29f   : > { %v810_v56 = vadd.f32 %v805_v48, %v804_v46  ;;  %v811_v57 = vsel %vm730_vm10, %v806_v50, 0.0  ;;  %v772_v47 = vmul.f32 %v766_v51, %v766_v51  ;;  %v795_v58 = vsub.f32 %v636_v7, %v1646_v35 }
 0x2a0   : > { %v782_v59 = vadd.f32 %v781_v53, %v780_v52  ;;  %v773_v60 = vmul.f32 %v767_v54, %v767_v54  ;;  %v777_v61 = vmul.f32 %v771_v55, %v1573_v32  ;;  %v796_v62 = vsub.f32 %v638_v10, %v1646_v35 }
 0x2a1   : > { %v812_v49 = vadd.f32 %v811_v57, %v810_v56  ;;  %v778_v1 = vmul.f32 %v772_v47, %v1575_v33  ;;  %v797_v2 = vsub.f32 %v1618_v63, %v1646_v35  ;;  %v801_v39 = vmul.f32 %v795_v58, %v795_v58 }
 0x2a2   : > { %783 = vadd.xlane.f32.xlu1 %v782_v59  ;;  %v779_v3 = vmul.f32 %v773_v60, %v1571_v31  ;;  %v802_v4 = vmul.f32 %v796_v62, %v796_v62 }
 0x2a3   : > { %v785_v5 = vadd.f32 %v778_v1, %v777_v61  ;;  %v803_v6 = vmul.f32 %v797_v2, %v797_v2  ;;  %v807_v7 = vmul.f32 %v801_v39, %v1573_v32 }
 0x2a4   : > { %v786_v8 = vsel %vm730_vm10, %v779_v3, 0.0  ;;  %v808_v9 = vmul.f32 %v802_v4, %v1575_v33 }
 0x2a5   : > { %v787_v10 = vadd.f32 %v786_v8, %v785_v5  ;;  %v809_v63 = vmul.f32 %v803_v6, %v1571_v31 }
 0x2a6   : > { %813 = vadd.xlane.f32.xlu1 %v812_v49  ;;  %v815_v11 = vadd.f32 %v808_v9, %v807_v7 }
 0x2a7   : > { %788 = vadd.xlane.f32.xlu0 %v787_v10  ;;  %v816_v12 = vsel %vm730_vm10, %v809_v63, 0.0 }
 0x2a8   : > { %v817_v13 = vadd.f32 %v816_v12, %v815_v11 }
 0x2ab   : > { %818 = vadd.xlane.f32.xlu0 %v817_v13 }
 0x2ac   : > { %1172 = shalt.err (!%p1169_p7)
}
 0x2ad   : > { %s1173_s10 = scalar_lea.hbm %s1681_s20, 768  ;;  %s1177_s7 = scalar_lea.hbm %s1734_s3, 3072 }
 0x2ae   : > { %p1174_p9 = scmp.ne.s32.totalorder %s1681_s20, %s1173_s10  ;;  %p1178_p5 = scmp.lt.u32.totalorder %s1681_s20, %s1734_s3 }
 0x2af   : > { %p1179_p10 = scmp.lt.u32.totalorder %s1177_s7, %s1173_s10  ;;  %p1181_p1 = scmp.lt.u32.totalorder %s1173_s10, %s1681_s20 }
 0x2b0   : > { %p1175_p11 = pnand %p1174_p9, %p1357_p12 }
 0x2b1   : > { %p1180_p2 = por %p1179_p10, %p1178_p5 }
 0x2b2   : > { %p1176_p0 = pneg %p1175_p11 }
 0x2b3   : > { %p1182_p4 = por %p1181_p1, %p1180_p2 }
 0x2b5   : > { %p1183_p6 = pnand %p1182_p4, %p1176_p0 }
 0x2b7   : > { %1186 = shalt.err (!%p1183_p6)
}
 0x2b8   : > { %s1247_s11 = smov 192   ;;  %s1248_s13 = smov 12   ;;  %vm824_vm11 = vcmask 7168   ;;  %vm827_vm12 = vcmask 15360  }
 0x2b9   : > { %1024 = dma.vmem_to_hbm [thread:$0]  (%p1357_p12), %s1676_s28, 768, %s1681_s20, %s831_s23, %s1247_s11, %s1247_s11, %s1248_s13  }
 0x2ba   : > { %p242_p8 = scmp.lt.s32.totalorder %s1295_s19, 3 }
 0x2bc   : > { %s1756_s19 = smov (!%p242_p8, %s1295_s19), 3 }
 0x2bd   : > { %s1005_s14 = sshll.u32 %s1756_s19, 4 }
 0x2be   : > { %s246_s25 = scalar_lea.vmem %s1735_s4, %s1005_s14 }
 0x32f   : > { %v784_v31 = vpop.xlane.xlu1 %783 }
 0x333   : > { %v814_v32 = vpop.xlane.xlu1 %813 }
 0x334   : > { %v820_v33 = vadd.f32 %v814_v32, %v784_v31  ;;  %v789_v14 = vpop.xlane.xlu0 %788 }
 0x336   : > { %v822_v15 = vmul.f32 0.001953125, %v820_v33 }
 0x338   : > { %v825_v16 = vsel %vm824_vm11, %v1636_v22, %v822_v15  ;;  %v819_v17 = vpop.xlane.xlu0 %818 }
 0x339   : > { %828 = vst.msk [vmem:[%s246_s25] sm:$0xff] %vm827_vm12, %v825_v16  ;;  %v821_v18 = vadd.f32 %v819_v17, %v789_v14 }
 0x33b   : > { %v823_v19 = vmul.f32 0.001953125, %v821_v18 }
 0x33d   : > { %v826_v20 = vsel %vm824_vm11, %v1646_v35, %v823_v19 }
 0x33e   : > { %829 = vst.msk [vmem:[%s246_s25 + $0x8] sm:$0xff] %vm827_vm12, %v826_v20 }
 0x33f PF: > { %p1041_p12 = scmp.ge.s32.totalorder %s1229_s18, 2  ;;  %s868_s19 = sand.u32 1, %s1217_s15  }
 0x340   : > { %p1750_p13 = scmp.ne.s32.totalorder %s1740_s22, 0  ;;  %s869_s30 = scalar_lea.sflag [#allocation4], %s868_s19 }
 0x342   : > { %p1035_p3 = pnand %p1041_p12, %p1750_p13 }
 0x344   : > { %1212 = dma.done.wait (!%p1035_p3), %s869_s30, 768  }
 0x345   : > { %1214 = vsyncadd (!%p1035_p3), %s869_s30, 4294966528  ;;  %p19_p7 = scmp.ge.s32.totalorder %s1327_s27, 6   ;;  %s1751_s15 = smov %s1221_s16 }
 0x346   : > { %s1752_s16 = smov %s1225_s17  ;;  %s1753_s17 = smov %s1353_s24 }
 0x347   : > { %s1754_s18 = smov %s1327_s27  ;;  %21 = sbr.rel (!%p19_p7) target bundleno = 6 (0x6), region = 95 }
 0x34e   :  { %882 = vsyncpa [#allocation3], 1 }
 0x34f   :  { %884 = vsyncpa [#allocation3 + $0x1], 1 }
 0x350   :  { %885 = vsyncpa [#allocation6], 1 }
 0x351   :  { %886 = vsyncpa [#allocation4], 1 }
 0x352   :  { %888 = vsyncpa [#allocation4 + $0x1], 1 }

</bundles_post_ra>
